<compile_context>
chip_gen: v7x
topology: tpu7x:2x2x1
jax: 0.10.0
libtpu: 0.0.40
codegen_flags: <defaults>
</compile_context>

<pallas_src>
import jax
import jax.numpy as jnp
from jax import lax
from jax.experimental import pallas as pl
from jax.experimental.pallas import tpu as pltpu


# ----------------------------------------------------------------------------
# Fused Pallas kernel: whole SIN forward in one body
# ----------------------------------------------------------------------------
def sin_fused_kernel(
    adj_ref,   # [B, npg, npg]  per-graph normalized adjacency blocks
    x_ref,     # [B, npg, dx]   node features, grouped per graph
    wg_ref,    # [dx, H]        GNN weight
    wt_ref,    # [H, D]         treatment readout weight
    cov_ref,   # [B, dc+1]      covariates, augmented with a ones column
    w1_ref,    # [dc+1, 3H+1]   fused first layers (+bias row, +bias lane)
    w2_ref,    # [3H+1, 2D+1]   block-diagonal second layers (+bias row)
    y_ref,     # [1, B]         lane-dense output row
):
    f32 = jnp.float32
    B, npg, dx = x_ref.shape
    N = B * npg
    H = wg_ref.shape[1]
    D = wt_ref.shape[1]

    # --- treatment branch: block-diagonal GCN step + mean pool + readout ---
    msg = jnp.einsum("bij,bjd->bid", adj_ref[...], x_ref[...],
                     preferred_element_type=f32)                       # [B, npg, dx]
    h = jnp.maximum(
        jnp.dot(msg.reshape(N, dx), wg_ref[...], preferred_element_type=f32),
        0.0,
    )                                                                  # [N, H]
    g = jnp.mean(h.reshape(B, npg, H), axis=1)                         # [B, H] (XLU)
    T = jnp.dot(g, wt_ref[...], preferred_element_type=f32)            # [B, D]

    # --- covariates / propensity / COMO nets: one wide 1st layer, one
    # block-diagonal 2nd layer; biases folded into the matmuls via the
    # constant-1 bias lane (relu(1) == 1).
    hid = jnp.maximum(
        jnp.dot(cov_ref[...], w1_ref[...], preferred_element_type=f32), 0.0
    )                                                                  # [B, 3H+1]
    out2 = jnp.dot(hid, w2_ref[...], preferred_element_type=f32)       # [B, 2D+1]
    C = out2[:, 0:D]
    P = out2[:, D:2 * D]
    como = out2[:, 2 * D:2 * D + 1]

    # --- head: Y = ((T - P) * C).sum(-1) + como, produced as a lane-dense
    # [1, B] row with ONE last-dim-contracting dot_general against ones.
    headcat = jnp.concatenate([(T - P) * C, como], axis=-1)            # [B, D+1]
    ones_row = jnp.ones((1, D + 1), f32)
    dn = (((1,), (1,)), ((), ()))  # contract last dims of lhs/rhs
    y_ref[...] = lax.dot_general(ones_row, headcat, dn,
                                 preferred_element_type=f32)           # [1, B]


# ----------------------------------------------------------------------------
# Wrapper
# ----------------------------------------------------------------------------
_VMEM_SPEC = pl.BlockSpec(memory_space=pltpu.MemorySpace.VMEM)


def sin_forward(params, adj_blocks, node_x, covariates):
    """Full SIN forward pass as a single fused Pallas kernel call.

    adj_blocks: [B, npg, npg] per-graph normalized adjacency blocks.
    node_x:     [B*npg, dx] node features (graphs are contiguous blocks).
    covariates: [B, dc].
    """
    f32 = jnp.float32
    B, dc = covariates.shape
    N, dx = node_x.shape
    npg = N // B
    H = params["wg"].shape[1]
    D = params["wt"].shape[1]

    # All covariate-MLP branches must share hidden width H and feature dim D
    # (the packed-weight fusion silently assumes it).
    assert params["wc1"].shape == (dc, H) and params["wp1"].shape == (dc, H)
    assert params["wm1"].shape == (dc, H)
    assert params["wc2"].shape == (H, D) and params["wp2"].shape == (H, D)
    assert params["wm2"].shape == (H, 1)
    assert adj_blocks.shape == (B, npg, npg) and N == B * npg

    # --- wrapper-side weight packing (tiny; ordinary XLA ops under jit) ---
    # First layer: wide [dc+1, 3H+1].  Last input row carries the biases; the
    # last output column is a constant-1 "bias lane" feeding the 2nd layer.
    w1cat = jnp.concatenate([params["wc1"], params["wp1"], params["wm1"]], axis=1)  # [dc, 3H]
    b1cat = jnp.concatenate([params["bc1"], params["bp1"], params["bm1"]], axis=1)  # [1, 3H]
    w1aug = jnp.zeros((dc + 1, 3 * H + 1), f32)
    w1aug = w1aug.at[:dc, :3 * H].set(w1cat)
    w1aug = w1aug.at[dc, :3 * H].set(b1cat[0])
    w1aug = w1aug.at[dc, 3 * H].set(1.0)

    # Second layer: block-diagonal [3H+1, 2D+1], columns = [C | P | como],
    # last row = packed biases (picked up by the constant-1 bias lane).
    b2cat = jnp.concatenate([params["bc2"], params["bp2"], params["bm2"]], axis=1)  # [1, 2D+1]
    w2aug = jnp.zeros((3 * H + 1, 2 * D + 1), f32)
    w2aug = w2aug.at[0 * H:1 * H, 0:D].set(params["wc2"])
    w2aug = w2aug.at[1 * H:2 * H, D:2 * D].set(params["wp2"])
    w2aug = w2aug.at[2 * H:3 * H, 2 * D:2 * D + 1].set(params["wm2"])
    w2aug = w2aug.at[3 * H, :].set(b2cat[0])

    cov_aug = jnp.concatenate([covariates.astype(f32), jnp.ones((B, 1), f32)], axis=1)
    x_blocks = node_x.reshape(B, npg, dx)

    args = (adj_blocks, x_blocks, params["wg"], params["wt"], cov_aug, w1aug, w2aug)

    flops = 2 * (B * npg * npg * dx      # block-diagonal GCN step
                 + N * dx * H            # GNN weight
                 + B * H * D             # treatment readout
                 + B * (dc + 1) * (3 * H + 1)      # fused first layers
                 + B * (3 * H + 1) * (2 * D + 1)   # block-diag second layers
                 + B * (D + 1))          # head reduction
    bytes_accessed = sum(int(a.size) * a.dtype.itemsize for a in args) + B * 4

    y_row = pl.pallas_call(
        sin_fused_kernel,
        out_shape=jax.ShapeDtypeStruct((1, B), f32),
        in_specs=[_VMEM_SPEC] * len(args),
        out_specs=_VMEM_SPEC,
        cost_estimate=pl.CostEstimate(flops=flops, transcendentals=0,
                                      bytes_accessed=bytes_accessed),
    )(*args)
    return y_row.reshape(-1)                                           # [B]


# ----------------------------------------------------------------------------
# Glue: graph construction + deterministic parameter init + jnp reference
# ----------------------------------------------------------------------------
def build_graph(num_graphs, nodes_per_graph):
    """Deterministic ring graph per sample. Returns the dense normalized
    adjacency (reference), per-graph blocks (kernel), batch assignments and
    the per-graph mean-pooling matrix (reference)."""
    N = num_graphs * nodes_per_graph
    adj = jnp.zeros((N, N), dtype=jnp.float32)
    idx = jnp.arange(N)
    adj = adj.at[idx, idx].set(1.0)
    for gidx in range(num_graphs):
        base = gidx * nodes_per_graph
        for i in range(nodes_per_graph):
            src = base + i
            dst = base + (i + 1) % nodes_per_graph
            adj = adj.at[src, dst].set(1.0)
            adj = adj.at[dst, src].set(1.0)
    adj = adj / jnp.sum(adj, axis=-1, keepdims=True)  # mean aggregation

    # adj is block-diagonal: extract the per-graph blocks exactly.
    adj_blocks = jnp.stack([
        adj[g * nodes_per_graph:(g + 1) * nodes_per_graph,
            g * nodes_per_graph:(g + 1) * nodes_per_graph]
        for g in range(num_graphs)
    ])

    batch_assignments = jnp.repeat(jnp.arange(num_graphs), nodes_per_graph)
    pool = (
        jax.nn.one_hot(batch_assignments, num_graphs, dtype=jnp.float32).T
        / float(nodes_per_graph)
    )  # [B, N] mean pooling
    return adj, adj_blocks, batch_assignments, pool


def init_params(key, dx, dc, hidden, dfeat):
    keys = jax.random.split(key, 12)
    s = 0.1
    return {
        # treatment GNN
        "wg": s * jax.random.normal(keys[0], (dx, hidden), jnp.float32),
        "wt": s * jax.random.normal(keys[1], (hidden, dfeat), jnp.float32),
        # covariates feature extractor
        "wc1": s * jax.random.normal(keys[2], (dc, hidden), jnp.float32),
        "bc1": s * jax.random.normal(keys[3], (1, hidden), jnp.float32),
        "wc2": s * jax.random.normal(keys[4], (hidden, dfeat), jnp.float32),
        "bc2": s * jax.random.normal(keys[5], (1, dfeat), jnp.float32),
        # propensity net
        "wp1": s * jax.random.normal(keys[6], (dc, hidden), jnp.float32),
        "bp1": s * jax.random.normal(keys[7], (1, hidden), jnp.float32),
        "wp2": s * jax.random.normal(keys[8], (hidden, dfeat), jnp.float32),
        "bp2": s * jax.random.normal(keys[9], (1, dfeat), jnp.float32),
        # COMO net (scalar per unit)
        "wm1": s * jax.random.normal(keys[10], (dc, hidden), jnp.float32),
        "bm1": jnp.zeros((1, hidden), jnp.float32),
        "wm2": s * jax.random.normal(keys[11], (hidden, 1), jnp.float32),
        "bm2": jnp.zeros((1, 1), jnp.float32),
    }


def sin_forward_ref(params, adj, node_x, pool, covariates):
    """Pure-jnp reference (dense adjacency + dense pooling) for correctness."""
    msg = adj @ node_x
    h = jnp.maximum(msg @ params["wg"], 0.0)
    T = (pool @ h) @ params["wt"]
    C = jnp.maximum(covariates @ params["wc1"] + params["bc1"], 0.0) @ params["wc2"] + params["bc2"]
    P = jnp.maximum(covariates @ params["wp1"] + params["bp1"], 0.0) @ params["wp2"] + params["bp2"]
    como = (jnp.maximum(covariates @ params["wm1"] + params["bm1"], 0.0) @ params["wm2"] + params["bm2"]).reshape(-1)
    return ((T - P) * C).sum(-1).reshape(-1) + como


# ----------------------------------------------------------------------------
if __name__ == "__main__":
    # Small, SIN-consistent shapes.
    num_graphs = 4          # batch size B (one treatment graph per unit)
    nodes_per_graph = 8     # N = 32 treatment-graph nodes total
    dx = 16                 # node feature dim
    dc = 16                 # covariates dim
    hidden = 32             # hidden width H
    dfeat = 32              # shared feature dim D

    key = jax.random.PRNGKey(0)
    k_param, k_x, k_cov = jax.random.split(key, 3)

    params = init_params(k_param, dx, dc, hidden, dfeat)
    adj, adj_blocks, batch_assignments, pool = build_graph(num_graphs, nodes_per_graph)

    node_x = jax.random.normal(
        k_x, (num_graphs * nodes_per_graph, dx), jnp.float32
    )
    covariates = jax.random.normal(k_cov, (num_graphs, dc), jnp.float32)

    sin_forward_jit = jax.jit(sin_forward)
    y = sin_forward_jit(params, adj_blocks, node_x, covariates)
    y = jax.block_until_ready(y)

    y_ref = sin_forward_ref(params, adj, node_x, pool, covariates)
    assert y.shape == (num_graphs,)
    assert jnp.allclose(y, y_ref, atol=1e-4, rtol=1e-4), (y, y_ref)

    print("KERNEL_OK")
</pallas_src>

<mosaic_0001>
module attributes {stable_mosaic.version = 11 : i64} {
  func.func @sin_fused_kernel(%arg0: memref<4x8x8xf32, #tpu.memory_space<vmem>>, %arg1: memref<4x8x16xf32, #tpu.memory_space<vmem>>, %arg2: memref<16x32xf32, #tpu.memory_space<vmem>>, %arg3: memref<32x32xf32, #tpu.memory_space<vmem>>, %arg4: memref<4x17xf32, #tpu.memory_space<vmem>>, %arg5: memref<17x97xf32, #tpu.memory_space<vmem>>, %arg6: memref<97x65xf32, #tpu.memory_space<vmem>>, %arg7: memref<1x4xf32, #tpu.memory_space<vmem>>) attributes {dimension_semantics = [], scalar_prefetch = 0 : i64, scratch_operands = 0 : i64, tpu.core_type = #tpu.core_type<tc>} {
    %c0 = arith.constant 0 : index
    %c0_0 = arith.constant 0 : index
    %c0_1 = arith.constant 0 : index
    %0 = vector.load %arg0[%c0, %c0_0, %c0_1] : memref<4x8x8xf32, #tpu.memory_space<vmem>>, vector<4x8x8xf32>
    %c0_2 = arith.constant 0 : index
    %c0_3 = arith.constant 0 : index
    %c0_4 = arith.constant 0 : index
    %1 = vector.load %arg1[%c0_2, %c0_3, %c0_4] : memref<4x8x16xf32, #tpu.memory_space<vmem>>, vector<4x8x16xf32>
    "tpu.trace_start"() <{level = 10 : i32, message = "bij,bjd->bid"}> : () -> ()
    %cst = arith.constant dense<0.000000e+00> : vector<4x8x16xf32>
    %2 = tpu.matmul %0, %1, %cst {dimension_numbers = #tpu.dot_dimension_numbers<[2], [1], [1], [2], [0, 0, 0, 1, 1, 2], [0], [0]>} : vector<4x8x8xf32>, vector<4x8x16xf32>, vector<4x8x16xf32> -> vector<4x8x16xf32>
    "tpu.trace_stop"() : () -> ()
    %3 = vector.shape_cast %2 : vector<4x8x16xf32> to vector<32x16xf32>
    %c0_5 = arith.constant 0 : index
    %c0_6 = arith.constant 0 : index
    %4 = vector.load %arg2[%c0_5, %c0_6] : memref<16x32xf32, #tpu.memory_space<vmem>>, vector<16x32xf32>
    %cst_7 = arith.constant dense<0.000000e+00> : vector<32x32xf32>
    %5 = tpu.matmul %3, %4, %cst_7 {dimension_numbers = #tpu.dot_dimension_numbers<[1], [0], [0], [1], [0, 0, 1, 1], [], []>} : vector<32x16xf32>, vector<16x32xf32>, vector<32x32xf32> -> vector<32x32xf32>
    %cst_8 = arith.constant 0.000000e+00 : f32
    %6 = vector.broadcast %cst_8 : f32 to vector<32x32xf32>
    %7 = arith.maximumf %5, %6 : vector<32x32xf32>
    %8 = vector.shape_cast %7 : vector<32x32xf32> to vector<4x8x32xf32>
    %cst_9 = arith.constant dense<0.000000e+00> : vector<4x32xf32>
    %9 = vector.multi_reduction <add>, %8, %cst_9 [1] : vector<4x8x32xf32> to vector<4x32xf32>
    %cst_10 = arith.constant 8.000000e+00 : f32
    %10 = vector.broadcast %cst_10 : f32 to vector<4x32xf32>
    %11 = arith.divf %9, %10 : vector<4x32xf32>
    %c0_11 = arith.constant 0 : index
    %c0_12 = arith.constant 0 : index
    %12 = vector.load %arg3[%c0_11, %c0_12] : memref<32x32xf32, #tpu.memory_space<vmem>>, vector<32x32xf32>
    %cst_13 = arith.constant dense<0.000000e+00> : vector<4x32xf32>
    %13 = tpu.matmul %11, %12, %cst_13 {dimension_numbers = #tpu.dot_dimension_numbers<[1], [0], [0], [1], [0, 0, 1, 1], [], []>} : vector<4x32xf32>, vector<32x32xf32>, vector<4x32xf32> -> vector<4x32xf32>
    %c0_14 = arith.constant 0 : index
    %c0_15 = arith.constant 0 : index
    %14 = vector.load %arg4[%c0_14, %c0_15] : memref<4x17xf32, #tpu.memory_space<vmem>>, vector<4x17xf32>
    %c0_16 = arith.constant 0 : index
    %c0_17 = arith.constant 0 : index
    %15 = vector.load %arg5[%c0_16, %c0_17] : memref<17x97xf32, #tpu.memory_space<vmem>>, vector<17x97xf32>
    %cst_18 = arith.constant dense<0.000000e+00> : vector<4x97xf32>
    %16 = tpu.matmul %14, %15, %cst_18 {dimension_numbers = #tpu.dot_dimension_numbers<[1], [0], [0], [1], [0, 0, 1, 1], [], []>} : vector<4x17xf32>, vector<17x97xf32>, vector<4x97xf32> -> vector<4x97xf32>
    %cst_19 = arith.constant 0.000000e+00 : f32
    %17 = vector.broadcast %cst_19 : f32 to vector<4x97xf32>
    %18 = arith.maximumf %16, %17 : vector<4x97xf32>
    %c0_20 = arith.constant 0 : index
    %c0_21 = arith.constant 0 : index
    %19 = vector.load %arg6[%c0_20, %c0_21] : memref<97x65xf32, #tpu.memory_space<vmem>>, vector<97x65xf32>
    %cst_22 = arith.constant dense<0.000000e+00> : vector<4x65xf32>
    %20 = tpu.matmul %18, %19, %cst_22 {dimension_numbers = #tpu.dot_dimension_numbers<[1], [0], [0], [1], [0, 0, 1, 1], [], []>} : vector<4x97xf32>, vector<97x65xf32>, vector<4x65xf32> -> vector<4x65xf32>
    %21 = vector.extract_strided_slice %20 {offsets = [0, 0], sizes = [4, 32], strides = [1, 1]} : vector<4x65xf32> to vector<4x32xf32>
    %22 = vector.extract_strided_slice %20 {offsets = [0, 32], sizes = [4, 32], strides = [1, 1]} : vector<4x65xf32> to vector<4x32xf32>
    %23 = vector.extract_strided_slice %20 {offsets = [0, 64], sizes = [4, 1], strides = [1, 1]} : vector<4x65xf32> to vector<4x1xf32>
    %24 = arith.subf %13, %22 : vector<4x32xf32>
    %25 = arith.mulf %24, %21 : vector<4x32xf32>
    %26 = tpu.concatenate %25, %23 in 1 : vector<4x32xf32>, vector<4x1xf32> -> vector<4x33xf32>
    %cst_23 = arith.constant 1.000000e+00 : f32
    %27 = vector.broadcast %cst_23 : f32 to vector<1x33xf32>
    %cst_24 = arith.constant dense<0.000000e+00> : vector<1x4xf32>
    %28 = tpu.matmul %27, %26, %cst_24 {dimension_numbers = #tpu.dot_dimension_numbers<[1], [1], [0], [0], [0, 0, 1, 0], [], []>} : vector<1x33xf32>, vector<4x33xf32>, vector<1x4xf32> -> vector<1x4xf32>
    %c0_25 = arith.constant 0 : index
    %c0_26 = arith.constant 0 : index
    %29 = vector.load %arg7[%c0_25, %c0_26] : memref<1x4xf32, #tpu.memory_space<vmem>>, vector<1x4xf32>
    tpu.vector_store %arg7[%c0_25, %c0_26], %28 {strides = array<i32>} : memref<1x4xf32, #tpu.memory_space<vmem>>, vector<1x4xf32>,
    return
  }
}

</mosaic_0001>

<bundles_post_ra>
// kernel: sin_forward.1
= control target key start
LH: loop header
LB: loop body
LE: loop exit
PB: predicated region body
PF: predicated region fallthrough
CT: control target
= control target key end

     0   :  { %v1024_v2 = vmov 0.0   ;;  %vm35_vm0 = vcmask 64512   ;;  %vm1025_vm1 = vmmov 0   ;;  %s1208_s0 = inlined_call_operand.vmem [shape: f32[4,8,8], index: 0, kind: input, shape index: {}]   ;;  %s1209_s1 = inlined_call_operand.vmem [shape: f32[4,8,16], index: 1, kind: input, shape index: {}]   ;;  %s1210_s2 = inlined_call_operand.vmem [shape: f32[16,32], index: 2, kind: input, shape index: {}]   ;;  %s1211_s3 = inlined_call_operand.vmem [shape: f32[32,32], index: 3, kind: input, shape index: {}]   ;;  %s1212_s4 = inlined_call_operand.vmem [shape: f32[4,17], index: 4, kind: input, shape index: {}]   ;;  %s1213_s5 = inlined_call_operand.vmem [shape: f32[17,97], index: 5, kind: input, shape index: {}]   ;;  %s1214_s6 = inlined_call_operand.vmem [shape: f32[97,65], index: 6, kind: input, shape index: {}]   ;;  %s1215_s7 = inlined_call_operand.hbm [shape: f32[1,4], index: 7, kind: output, shape index: {}]  }
   0x1   :  { %v31_v0 = vld [vmem:[%s1209_s1] sm:$0xff]  ;;  %v32_v1 = vld [vmem:[%s1209_s1 + $0x8] sm:$0xff]  ;;  %879 = vmatprep.subr.mxu0 %v1024_v2  ;;  %884 = vmatprep.subr.mxu1 %v1024_v2  ;;  %v33_v5 = vld [vmem:[%s1209_s1 + $0x10] sm:$0xff] }
   0x2   :  { %v27_v3 = vld [vmem:[%s1208_s0] sm:$0xff]  ;;  %v28_v4 = vld [vmem:[%s1208_s0 + $0x8] sm:$0xff]  ;;  %880 = vmatpush3.msra.mxu0 %v31_v0  ;;  %881 = vmatprep.mubr.msk.f32.mxu0 %vm1025_vm1, %v1024_v2  ;;  %v34_v7 = vld [vmem:[%s1209_s1 + $0x18] sm:$0xff] }
   0x3   :  { %v328_v6 = vld [vmem:[%s1210_s2] sm:$0xff]  ;;  %885 = vmatpush3.msra.mxu1 %v32_v1  ;;  %886 = vmatprep.mubr.msk.f32.mxu1 %vm1025_vm1, %v1024_v2  ;;  %v329_v8 = vld [vmem:[%s1210_s2 + $0x8] sm:$0xff] }
   0x4   :  { %12 = vsyncpa [#allocation3], 0  ;;  %882 = vmatmul.mubr.msk.f32.vlgmr.msra.gmra.mrb[0].mxu0 %vm35_vm0, %v27_v3  ;;  %887 = vmatmul.mubr.msk.f32.vlgmr.msra.gmra.mrb[0].mxu1 %vm35_vm0, %v28_v4  ;;  %v29_v9 = vld [vmem:[%s1208_s0 + $0x10] sm:$0xff]  ;;  %v30_v10 = vld [vmem:[%s1208_s0 + $0x18] sm:$0xff]  ;;  %v963_v11 = vpack.c.bf16 %v329_v8, %v328_v6  ;;  %vm330_vm2 = vcmask 130048   ;;  %v1026_v23 = vmov 0.0|0.0  }
   0x5   :  { %889 = vmatprep.subr.mxu0 %v1024_v2  ;;  %894 = vmatprep.subr.mxu1 %v1024_v2  ;;  %v466_v20 = vld [vmem:[%s1211_s3] sm:$0xff]  ;;  %v467_v21 = vld [vmem:[%s1211_s3 + $0x8] sm:$0xff]  ;;  %v468_v24 = vld [vmem:[%s1211_s3 + $0x10] sm:$0xff]  ;;  %vm432_vm3 = vcmask 261120   ;;  %vm474_vm4 = vcmask 1041409   ;;  %vm476_vm5 = vcmask 1042434  }
   0x6   :  { %890 = vmatpush3.msra.mxu0 %v33_v5  ;;  %895 = vmatpush3.msra.mxu1 %v34_v7  ;;  %v968_v22 = vpack.c.bf16 %v467_v21, %v466_v20  ;;  %v469_v25 = vld [vmem:[%s1211_s3 + $0x18] sm:$0xff]  ;;  %v635_v27 = vld [vmem:[%s1214_s6] sm:$0xff]  ;;  %v636_v28 = vld [vmem:[%s1214_s6 + $0x8] sm:$0xff]  ;;  %vm478_vm6 = vcmask 1043459   ;;  %vm560_vm7 = vcmask 1040384   ;;  %vm556_vm8 = vcmask 138240  }
   0x7   :  { %891 = vmatprep.mubr.msk.f32.mxu0 %vm1025_vm1, %v1024_v2  ;;  %896 = vmatprep.mubr.msk.f32.mxu1 %vm1025_vm1, %v1024_v2  ;;  %v971_v26 = vpack.c.bf16 %v469_v25, %v468_v24  ;;  %v637_v29 = vld [vmem:[%s1214_s6 + $0x10] sm:$0xff]  ;;  %v977_v30 = vpack.c.bf16 %v636_v28, %v635_v27  ;;  %v638_v31 = vld [vmem:[%s1214_s6 + $0x18] sm:$0xff]  ;;  %v639_v33 = vld [vmem:[%s1214_s6 + $0x20] sm:$0xff]  ;;  %vm648_vm9 = vcmask 793600   ;;  %s1027_s8 = smov 96   ;;  %vm732_vm10 = vcmask 269312  }
   0x8   :  { %892 = vmatmul.mubr.msk.f32.vlgmr.msra.gmra.mrb[2].mxu0 %vm35_vm0, %v29_v9  ;;  %897 = vmatmul.mubr.msk.f32.vlgmr.msra.gmra.mrb[2].mxu1 %vm35_vm0, %v30_v10  ;;  %v980_v32 = vpack.c.bf16 %v638_v31, %v637_v29  ;;  %v640_v34 = vld [vmem:[%s1214_s6 + $0x28] sm:$0xff]  ;;  %v641_v36 = vld [vmem:[%s1214_s6 + $0x30] sm:$0xff]  ;;  %v642_v37 = vld [vmem:[%s1214_s6 + $0x38] sm:$0xff]  ;;  %vm809_vm11 = vcmask 24576  }
   0x9   :  { %964 = vmatprep.subr.bf16.mxu0 %v963_v11  ;;  %955 = vmatprep.mubr.msk.f32.mxu1 %vm1025_vm1, %v1024_v2  ;;  %v983_v35 = vpack.c.bf16 %v640_v34, %v639_v33  ;;  %v986_v38 = vpack.c.bf16 %v642_v37, %v641_v36  ;;  %v643_v39 = vld [vmem:[%s1214_s6 + $0x40] sm:$0xff]  ;;  %v644_v40 = vld [vmem:[%s1214_s6 + $0x48] sm:$0xff]  ;;  %v555_v25 = vld [vmem:[%s1213_s5 + $0x10] sm:$0x1] }
   0xa   :  { %966 = vmatpush3.bf16.msra.mxu0 %v963_v11  ;;  %976 = vmatprep.subr.bf16.mxu1 %v1026_v23  ;;  %v989_v41 = vpack.c.bf16 %v644_v40, %v643_v39  ;;  %v645_v27 = vld [vmem:[%s1214_s6 + $0x50] sm:$0xff]  ;;  %v646_v28 = vld [vmem:[%s1214_s6 + $0x58] sm:$0xff] }
   0xb   :  { %967 = vmatprep.subr.bf16.mxu0 %v1026_v23  ;;  %978 = vmatpush3.bf16.msra.mxu1 %v977_v30  ;;  %v992_v29 = vpack.c.bf16 %v646_v28, %v645_v27  ;;  %v647_v30 = vld [vmem:[%s1214_s6 + $0x60] sm:$0x1]  ;;  %s1029_s6 = smov [#allocation2]  }
   0xc   :  { %979 = vmatprep.subr.bf16.mxu1 %v1026_v23  ;;  %s817_s9 = sshll.u32 %s1029_s6, 4  ;;  %s818_s9 = int_to_ptr.vmem [resolvable:$true] %s817_s9 }
   0xd   :  { %s1000_s10 = scalar_lea.vmem %s818_s9, 16  ;;  %s1004_s3 = scalar_lea.vmem %s818_s9, 32 }
   0xe   :  { %p1001_p0 = scmp.ne.s32.totalorder %s818_s9, %s1000_s10  ;;  %p1005_p1 = scmp.lt.s32.totalorder %s818_s9, %s818_s9 }
   0xf   :  { %981 = vmatpush3.bf16.msra.mxu1 %v980_v32  ;;  %p1006_p2 = scmp.lt.s32.totalorder %s1004_s3, %s1000_s10 }
  0x10   :  { %982 = vmatprep.subr.bf16.mxu1 %v1026_v23 }
  0x11   :  { %p1007_p3 = por %p1006_p2, %p1005_p1 }
  0x13   :  { %984 = vmatpush3.bf16.msra.mxu1 %v983_v35  ;;  %p1008_p4 = pnand %p1007_p3, %p1001_p0 }
  0x14   :  { %985 = vmatprep.subr.bf16.mxu1 %v1026_v23 }
  0x17   :  { %987 = vmatpush3.bf16.msra.mxu1 %v986_v38 }
  0x18   :  { %988 = vmatprep.subr.bf16.mxu1 %v1026_v23 }
  0x1b   :  { %990 = vmatpush3.bf16.msra.mxu1 %v989_v41  ;;  %v1028_v41 = vmov 1.0  }
  0x1c   :  { %991 = vmatprep.subr.bf16.mxu1 %v1026_v23 }
  0x1f   :  { %993 = vmatpush3.bf16.msra.mxu1 %v992_v29 }
  0x20   :  { %953 = vmatprep.subr.mxu1 %v1024_v2 }
  0x23   :  { %954 = vmatpush3.msk.msra.mxu1 %vm560_vm7, %v647_v30 }
  0xd7   :  { %v105_v12 = vpop.f32.mrb[0].mxu0  ;;  %v178_v13 = vpop.f32.mrb[0].mxu1 }
  0xd8   :  { %v883_v14 = vpop.f32.mrb[1].mxu0  ;;  %v888_v15 = vpop.f32.mrb[1].mxu1  ;;  %903 = vmatprep.mubr.msk.f32.mxu0 %vm330_vm2, %v105_v12 }
  0xd9   :  { %904 = vmatmul.mubr.msk.f32.vlgmr.msra.gmra.mrb[4].mxu0 %vm330_vm2, %v178_v13 }
  0xda   :  { %969 = vmatpush3.bf16.msra.mxu0 %v968_v22 }
  0xdb   :  { %v251_v16 = vpop.f32.mrb[2].mxu0  ;;  %v324_v17 = vpop.f32.mrb[2].mxu1  ;;  %970 = vmatprep.subr.bf16.mxu0 %v1026_v23 }
  0xdc   :  { %v893_v18 = vpop.f32.mrb[3].mxu0  ;;  %v898_v19 = vpop.f32.mrb[3].mxu1  ;;  %906 = vmatprep.mubr.msk.f32.mxu0 %vm330_vm2, %v251_v16 }
  0xdd   :  { %907 = vmatmul.mubr.msk.f32.gmra.mrb[6].mxu0 %vm330_vm2, %v324_v17  ;;  %v553_v18 = vld [vmem:[%s1213_s5] sm:$0xff]  ;;  %v554_v19 = vld [vmem:[%s1213_s5 + $0x8] sm:$0xff] }
  0xde   :  { %917 = vmatprep.mubr.msk.f32.mxu0 %vm1025_vm1, %v1024_v2  ;;  %972 = vmatpush3.bf16.msra.mxu0 %v971_v26  ;;  %v974_v22 = vpack.c.bf16 %v554_v19, %v553_v18  ;;  %v552_v26 = vld [vmem:[%s1212_s4] sm:$0xf] }
  0xdf   :  { %973 = vmatprep.subr.bf16.mxu0 %v1026_v23 }
 0x1ac   :  { %v905_v42 = vpop.f32.mrb[4].mxu0 }
 0x1ad   :  { %v429_v43 = vmax.f32 %v905_v42, 0.0  ;;  %v409_v44 = vpop.f32.mrb[5].mxu0 }
 0x1ae   :  { %v428_v45 = vmax.f32 %v409_v44, 0.0 }
 0x1af   :  { %v440_v46 = vsel %vm432_vm3, %v429_v43, 0.0 }
 0x1b0   :  { %v441_v47 = vrot.slane %v440_v46, 4  ;;  %v433_v48 = vsel %vm432_vm3, %v428_v45, 0.0  ;;  %v908_v49 = vpop.f32.mrb[6].mxu0 }
 0x1b1   :  { %v434_v50 = vrot.slane %v433_v48, 4  ;;  %v431_v51 = vmax.f32 %v908_v49, 0.0  ;;  %v419_v52 = vpop.f32.mrb[7].mxu0 }
 0x1b2   :  { %v442_v53 = vadd.f32 %v441_v47, %v440_v46  ;;  %v430_v54 = vmax.f32 %v419_v52, 0.0 }
 0x1b3   :  { %v435_v55 = vadd.f32 %v434_v50, %v433_v48  ;;  %v454_v56 = vsel %vm432_vm3, %v431_v51, 0.0 }
 0x1b4   :  { %v443_v57 = vrot.slane %v442_v53, 2  ;;  %v455_v58 = vrot.slane %v454_v56, 4  ;;  %v447_v59 = vsel %vm432_vm3, %v430_v54, 0.0 }
 0x1b5   :  { %v436_v60 = vrot.slane %v435_v55, 2  ;;  %v448_v61 = vrot.slane %v447_v59, 4 }
 0x1b6   :  { %v444_v62 = vadd.f32 %v443_v57, %v442_v53  ;;  %v456_v63 = vadd.f32 %v455_v58, %v454_v56 }
 0x1b7   :  { %v437_v0 = vadd.f32 %v436_v60, %v435_v55  ;;  %v449_v1 = vadd.f32 %v448_v61, %v447_v59 }
 0x1b8   :  { %v445_v3 = vrot.slane %v444_v62, 1  ;;  %v457_v4 = vrot.slane %v456_v63, 2 }
 0x1b9   :  { %v438_v5 = vrot.slane %v437_v0, 1  ;;  %v450_v6 = vrot.slane %v449_v1, 2 }
 0x1ba   :  { %v446_v7 = vadd.f32 %v445_v3, %v444_v62  ;;  %v458_v8 = vadd.f32 %v457_v4, %v456_v63 }
 0x1bb   :  { %v439_v9 = vadd.f32 %v438_v5, %v437_v0  ;;  %v451_v10 = vadd.f32 %v450_v6, %v449_v1 }
 0x1bc   :  { %v463_v11 = vmul.f32 0.125, %v446_v7  ;;  %v459_v12 = vrot.slane %v458_v8, 1 }
 0x1bd   :  { %v462_v13 = vmul.f32 0.125, %v439_v9  ;;  %v452_v14 = vrot.slane %v451_v10, 1 }
 0x1be   :  { %v460_v15 = vadd.f32 %v459_v12, %v458_v8 }
 0x1bf   :  { %v475_v16 = vsel %vm474_vm4, %v463_v11, %v462_v13  ;;  %v453_v17 = vadd.f32 %v452_v14, %v451_v10 }
 0x1c0   :  { %v465_v21 = vmul.f32 0.125, %v460_v15 }
 0x1c1   :  { %v464_v20 = vmul.f32 0.125, %v453_v17 }
 0x1c3   :  { %v477_v23 = vsel %vm476_vm5, %v464_v20, %v475_v16 }
 0x1c4   :  { %v479_v24 = vsel %vm478_vm6, %v465_v21, %v477_v23 }
 0x1c5   :  { %918 = vmatmul.mubr.msk.f32.vlgmr.msra.gmra.mrb[8].mxu0 %vm432_vm3, %v479_v24 }
 0x1c6   :  { %975 = vmatpush3.bf16.msra.mxu0 %v974_v22  ;;  %926 = vmatprep.mubr.msk.f32.mxu0 %vm1025_vm1, %v1024_v2 }
 0x1c7   :  { %924 = vmatprep.subr.mxu0 %v1024_v2 }
 0x1ca   :  { %925 = vmatpush3.msk.msra.mxu0 %vm560_vm7, %v555_v25 }
 0x1cb   :  { %927 = vmatmul.mubr.msk.f32.vlgmr.msra.gmra.mrb[10].mxu0 %vm556_vm8, %v552_v26  ;;  %958 = vmatprep.subr.mxu0 %v1024_v2 }
 0x1cc   :  { %960 = vmatprep.mubr.msk.f32.mxu0 %vm1025_vm1, %v1024_v2 }
 0x298   :  { %v548_v31 = vpop.f32.mrb[8].mxu0 }
 0x299   :  { %v919_v32 = vpop.f32.mrb[9].mxu0 }
 0x29e   :  { %v630_v33 = vpop.f32.mrb[10].mxu0 }
 0x29f   :  { %v634_v34 = vmax.f32 %v630_v33, 0.0  ;;  %v928_v35 = vpop.f32.mrb[11].mxu0 }
 0x2a1   :  { %956 = vmatmul.mubr.msk.f32.vlgmr.msra.gmra.mrb[4].mxu1 %vm648_vm9, %v634_v34 }
 0x374   :  { %v721_v36 = vpop.f32.mrb[4].mxu1 }
 0x375   :  { %v957_v37 = vpop.f32.mrb[5].mxu1  ;;  %726 = vrot.lane.b32.xlu0 %v721_v36, %s1027_s8 }
 0x3e7   :  { %v727_v38 = vpop.permute.xlu0 %726 }
 0x3e8   :  { %v729_v39 = vsub.f32 %v548_v31, %v727_v38 }
 0x3ea   :  { %v730_v40 = vmul.f32 %v729_v39, %v721_v36 }
 0x3ec   :  { %v731_v2 = vsel %vm432_vm3, %v730_v40, %v727_v38 }
 0x3ed   :  { %959 = vmatpush3.xpose.msk.msra.mxu0 %vm732_vm10, %v731_v2 }
 0x3f0   :  { %961 = vmatmul.mubr.msk.f32.vlgmr.msra.gmra.mrb[12].mxu0 %vm732_vm10, %v1028_v41 }
 0x4c3   :  { %v805_v42 = vpop.f32.mrb[12].mxu0 }
 0x4c4   :  { %810 = vst.msk [vmem:[#allocation2] sm:$0x1] %vm809_vm11, %v805_v42  ;;  %v962_v43 = vpop.f32.mrb[13].mxu0 }
 0x4c5   :  { %1011 = shalt.err (!%p1008_p4)
}
 0x4c6   :  { %s1012_s13 = scalar_lea.hbm %s1215_s7, 16 }
 0x4c7   :  { %p1013_p5 = scmp.ne.s32.totalorder %s1215_s7, %s1012_s13  ;;  %p1016_p6 = scmp.lt.u32.totalorder %s1012_s13, %s1215_s7 }
 0x4c9   :  { %p1018_p7 = pnand %p1016_p6, %p1013_p5 }
 0x4cb   :  { %1021 = shalt.err (!%p1018_p7)
}
 0x4cc   :  { %820 = dma.vmem_to_hbm [thread:$0]  %s818_s9, 16, %s1215_s7, [#allocation3]  }
 0x4cd   :  { %1022 = dma.done.wait [#allocation3], 16  }
 0x4ce   :  { %1023 = vsyncadd [#allocation3], 4294967280 }
 0x4cf   :  { %824 = vsyncpa [#allocation3], 1 }

</bundles_post_ra>
